<compile_context>
chip_gen: v7x
topology: tpu7x:2x2x1
jax: 0.10.0
libtpu: 0.0.40
codegen_flags: <defaults>
</compile_context>

<pallas_src>
import jax
import jax.numpy as jnp
from jax.experimental import pallas as pl
from jax.experimental.pallas import tpu as pltpu


def _make_pskd_kernel(tb: int, b_total: int):
    def kernel(x_ref, t_ref, out_ref):
        # x_ref, t_ref: (tb, C) VMEM tiles.  out_ref: (1, 8, 128) f32 block.
        x = x_ref[...].astype(jnp.float32)
        t = t_ref[...].astype(jnp.float32)

        # Numerically-stable log-sum-exp along the class (lane) axis.
        m = jnp.max(x, axis=1, keepdims=True)                           # (tb, 1)
        lse = jnp.log(jnp.sum(jnp.exp(x - m), axis=1, keepdims=True))   # (tb, 1)

        # Fused soft-CE: -sum_c t*(x - m - lse) == sum_c t * ((m + lse) - x).
        row_loss = jnp.sum(t * ((m + lse) - x), axis=1, keepdims=True)  # (tb, 1)

        # Mask rows past the true batch size in the ragged last tile.  Those
        # rows contain garbage (possibly NaN/Inf) logits/targets, so a select
        # (not a multiply) is required to zero them exactly.
        row0 = pl.program_id(0) * tb
        rows = row0 + jax.lax.broadcasted_iota(jnp.int32, (tb, 1), 0)
        row_loss = jnp.where(rows < b_total, row_loss, jnp.float32(0.0))

        partial = jnp.sum(row_loss)                                     # scalar
        # Replicate across the aligned (1, 8, 128) block (lane-dense, unmasked
        # store); the wrapper reads only element [i, 0, 0] of each block.
        out_ref[...] = jnp.broadcast_to(partial, out_ref.shape).astype(jnp.float32)

    return kernel


@jax.jit
def pskd_cross_entropy(output: jax.Array, targets: jax.Array) -> jax.Array:
    """Soft-target cross entropy matching Custom_CrossEntropy_PSKD.forward."""
    assert output.ndim == 2 and output.shape == targets.shape
    B, C = output.shape

    x_bytes = jnp.dtype(output.dtype).itemsize
    t_bytes = jnp.dtype(targets.dtype).itemsize

    # --- Tile-size policy (dtype aware, bytes-based, no row cap) -----------
    row_in_bytes = C * (x_bytes + t_bytes)          # both inputs, one row
    row_vmem_bytes = 2 * row_in_bytes + 4 * C * 4   # 2x-buffered inputs + f32 temps
    VMEM_BUDGET = 40 << 20                          # safe on v7x (64 MiB physical)
    DMA_STEP_TARGET = 8 << 20                       # input bytes moved per grid step
    tb = min(VMEM_BUDGET // row_vmem_bytes, DMA_STEP_TARGET // row_in_bytes)
    tb = max(8, (tb // 8) * 8)

    if B >= 8:
        # Keep the block no larger than the largest 8-aligned prefix of B so
        # only the *last* tile is ragged (standard, well-supported case).
        tb = min(tb, (B // 8) * 8)
    else:
        # Tiny batch: a single block equal to the full array dims is allowed
        # even when it is not 8-aligned.
        tb = B

    num_tiles = pl.cdiv(B, tb)

    # Computed (not hard-coded) scoped-VMEM limit: modeled usage + headroom.
    vmem_est = tb * row_vmem_bytes + 2 * 8 * 128 * 4
    vmem_limit = int(min(vmem_est + (16 << 20), 112 << 20))

    kernel = _make_pskd_kernel(tb, B)

    partials = pl.pallas_call(
        kernel,
        out_shape=jax.ShapeDtypeStruct((num_tiles, 8, 128), jnp.float32),
        grid_spec=pltpu.PrefetchScalarGridSpec(
            num_scalar_prefetch=0,
            grid=(num_tiles,),
            in_specs=[
                pl.BlockSpec((tb, C), lambda i: (i, 0)),
                pl.BlockSpec((tb, C), lambda i: (i, 0)),
            ],
            out_specs=pl.BlockSpec((1, 8, 128), lambda i: (i, 0, 0)),
        ),
        compiler_params=pltpu.CompilerParams(
            dimension_semantics=("parallel",),
            vmem_limit_bytes=vmem_limit,
        ),
    )(output, targets)

    # Final reduction + divide by the *global* batch size (mean over dim 0).
    return jnp.sum(partials[:, 0, 0]) / jnp.float32(B)


def pskd_cross_entropy_ref(output: jax.Array, targets: jax.Array) -> jax.Array:
    log_probs = jax.nn.log_softmax(output.astype(jnp.float32), axis=1)
    return jnp.sum(jnp.mean(-targets.astype(jnp.float32) * log_probs, axis=0))


if __name__ == "__main__":
    key = jax.random.PRNGKey(0)
    k1, k2, k3, k4, k5, k6 = jax.random.split(key, 6)

    # Case 1: aligned batch (B multiple of 8).
    B, C = 8, 32
    logits = jax.random.normal(k1, (B, C), dtype=jnp.float32)
    soft_targets = jax.nn.softmax(
        jax.random.normal(k2, (B, C), dtype=jnp.float32), axis=1
    )
    loss = pskd_cross_entropy(logits, soft_targets)
    jax.block_until_ready(loss)
    ref = pskd_cross_entropy_ref(logits, soft_targets)
    assert jnp.allclose(loss, ref, atol=1e-4, rtol=1e-4), (loss, ref)

    # Case 2: ragged batch (exercises in-kernel masking of the last tile).
    B2, C2 = 10, 32
    logits2 = jax.random.normal(k3, (B2, C2), dtype=jnp.float32)
    soft_targets2 = jax.nn.softmax(
        jax.random.normal(k4, (B2, C2), dtype=jnp.float32), axis=1
    )
    loss2 = pskd_cross_entropy(logits2, soft_targets2)
    jax.block_until_ready(loss2)
    ref2 = pskd_cross_entropy_ref(logits2, soft_targets2)
    assert jnp.allclose(loss2, ref2, atol=1e-4, rtol=1e-4), (loss2, ref2)

    # Case 3: tiny batch (B < 8, single full-array block) with bf16 inputs.
    B3, C3 = 5, 32
    logits3 = jax.random.normal(k5, (B3, C3), dtype=jnp.float32).astype(jnp.bfloat16)
    soft_targets3 = jax.nn.softmax(
        jax.random.normal(k6, (B3, C3), dtype=jnp.float32), axis=1
    ).astype(jnp.bfloat16)
    loss3 = pskd_cross_entropy(logits3, soft_targets3)
    jax.block_until_ready(loss3)
    ref3 = pskd_cross_entropy_ref(logits3, soft_targets3)
    assert jnp.allclose(loss3, ref3, atol=2e-2, rtol=2e-2), (loss3, ref3)

    print("KERNEL_OK")
</pallas_src>

<mosaic_0001>
module attributes {stable_mosaic.version = 11 : i64} {
  func.func @kernel(%arg0: i32, %arg1: memref<8x32xf32, #tpu.memory_space<vmem>>, %arg2: memref<8x32xf32, #tpu.memory_space<vmem>>, %arg3: memref<1x8x128xf32, #tpu.memory_space<vmem>>) attributes {dimension_semantics = [#tpu.dimension_semantics<parallel>], iteration_bounds = array<i64: 1>, scalar_prefetch = 0 : i64, scratch_operands = 0 : i64, tpu.core_type = #tpu.core_type<tc>, window_params = [{transform_indices = @transform_0, window_bounds = array<i64: 8, 32>}, {transform_indices = @transform_1, window_bounds = array<i64: 8, 32>}, {transform_indices = @transform_2, window_bounds = array<i64: 1, 8, 128>}]} {
    %c0 = arith.constant 0 : index
    %c0_0 = arith.constant 0 : index
    %0 = vector.load %arg1[%c0, %c0_0] : memref<8x32xf32, #tpu.memory_space<vmem>>, vector<8x32xf32>
    %c0_1 = arith.constant 0 : index
    %c0_2 = arith.constant 0 : index
    %1 = vector.load %arg2[%c0_1, %c0_2] : memref<8x32xf32, #tpu.memory_space<vmem>>, vector<8x32xf32>
    %cst = arith.constant dense<0xFF800000> : vector<8xf32>
    %2 = vector.multi_reduction <maximumf>, %0, %cst [1] : vector<8x32xf32> to vector<8xf32>
    %3 = vector.shape_cast %2 : vector<8xf32> to vector<8x1xf32>
    %4 = vector.broadcast %3 : vector<8x1xf32> to vector<8x32xf32>
    %5 = arith.subf %0, %4 : vector<8x32xf32>
    %6 = math.exp %5 : vector<8x32xf32>
    %cst_3 = arith.constant dense<0.000000e+00> : vector<8xf32>
    %7 = vector.multi_reduction <add>, %6, %cst_3 [1] : vector<8x32xf32> to vector<8xf32>
    %8 = vector.shape_cast %7 : vector<8xf32> to vector<8x1xf32>
    %9 = math.log %8 : vector<8x1xf32>
    %10 = arith.addf %3, %9 : vector<8x1xf32>
    %11 = vector.broadcast %10 : vector<8x1xf32> to vector<8x32xf32>
    %12 = arith.subf %11, %0 : vector<8x32xf32>
    %13 = arith.mulf %1, %12 : vector<8x32xf32>
    %cst_4 = arith.constant dense<0.000000e+00> : vector<8xf32>
    %14 = vector.multi_reduction <add>, %13, %cst_4 [1] : vector<8x32xf32> to vector<8xf32>
    %15 = vector.shape_cast %14 : vector<8xf32> to vector<8x1xf32>
    %c8_i32 = arith.constant 8 : i32
    %16 = arith.muli %arg0, %c8_i32 : i32
    %17 = tpu.iota {dimensions = array<i32: 0>} : vector<8x1xi32>
    %18 = vector.broadcast %16 : i32 to vector<8x1xi32>
    %19 = arith.addi %18, %17 : vector<8x1xi32>
    %c8_i32_5 = arith.constant 8 : i32
    %20 = vector.broadcast %c8_i32_5 : i32 to vector<8x1xi32>
    %21 = arith.cmpi slt, %19, %20 : vector<8x1xi32>
    %cst_6 = arith.constant 0.000000e+00 : f32
    %22 = vector.broadcast %cst_6 : f32 to vector<8x1xf32>
    %23 = arith.select %21, %15, %22 : vector<8x1xi1>, vector<8x1xf32>
    %24 = vector.shape_cast %23 : vector<8x1xf32> to vector<1x8x1xf32>
    %cst_7 = arith.constant dense<0.000000e+00> : vector<1xf32>
    %25 = vector.multi_reduction <add>, %24, %cst_7 [1, 2] : vector<1x8x1xf32> to vector<1xf32>
    %26 = vector.shape_cast %25 : vector<1xf32> to vector<1x1x1xf32>
    %27 = vector.extract %26[0, 0, 0] : f32 from vector<1x1x1xf32>
    %28 = vector.broadcast %27 : f32 to vector<1x8x128xf32>
    %c0_8 = arith.constant 0 : index
    %c0_9 = arith.constant 0 : index
    %c0_10 = arith.constant 0 : index
    %29 = vector.load %arg3[%c0_8, %c0_9, %c0_10] : memref<1x8x128xf32, #tpu.memory_space<vmem>>, vector<1x8x128xf32>
    tpu.vector_store %arg3[%c0_8, %c0_9, %c0_10], %28 {strides = array<i32>} : memref<1x8x128xf32, #tpu.memory_space<vmem>>, vector<1x8x128xf32>,
    return
  }
  func.func @transform_0(%arg0: i32) -> (i32, i32) {
    %c0_i32 = arith.constant 0 : i32
    %c0_i32_0 = arith.constant 0 : i32
    return %arg0, %c0_i32 : i32, i32
  }
  func.func @transform_1(%arg0: i32) -> (i32, i32) {
    %c0_i32 = arith.constant 0 : i32
    %c0_i32_0 = arith.constant 0 : i32
    return %arg0, %c0_i32 : i32, i32
  }
  func.func @transform_2(%arg0: i32) -> (i32, i32, i32) {
    %c0_i32 = arith.constant 0 : i32
    %c0_i32_0 = arith.constant 0 : i32
    %c0_i32_1 = arith.constant 0 : i32
    return %arg0, %c0_i32, %c0_i32_0 : i32, i32, i32
  }
}

</mosaic_0001>

<bundles_post_ra>
// kernel: pskd_cross_entropy.1
= control target key start
LH: loop header
LB: loop body
LE: loop exit
PB: predicated region body
PF: predicated region fallthrough
CT: control target
= control target key end

     0   :  { %7 = vsyncpa [#allocation3], 0  ;;  %s184_s0 = inlined_call_operand.hbm [shape: f32[8,32], index: 0, kind: input, shape index: {}]   ;;  %s185_s1 = inlined_call_operand.hbm [shape: f32[8,32], index: 1, kind: input, shape index: {}]   ;;  %s186_s2 = inlined_call_operand.vmem [shape: f32[1,8,128], index: 2, kind: output, shape index: {}]  }
   0x1   :  { %8 = vsyncpa [#allocation5], 0  ;;  %s137_s9 = smov [#allocation2]   ;;  %s138_s11 = smov [#allocation4]  }
   0x2   :  { %s15_s10 = sshll.u32 %s137_s9, 4  ;;  %s25_s12 = sshll.u32 %s138_s11, 4  ;;  %s16_s10 = int_to_ptr.vmem [resolvable:$true] %s15_s10  ;;  %s26_s12 = int_to_ptr.vmem [resolvable:$true] %s25_s12 }
   0x3   :  { %s89_s15 = scalar_lea.hbm %s184_s0, 128 }
   0x4   :  { %p90_p0 = scmp.ne.s32.totalorder %s184_s0, %s89_s15  ;;  %p93_p1 = scmp.lt.u32.totalorder %s89_s15, %s184_s0 }
   0x6   :  { %p95_p2 = pnand %p93_p1, %p90_p0 }
   0x8   :  { %98 = shalt.err (!%p95_p2)
}
   0x9   :  { %s99_s20 = scalar_lea.vmem %s16_s10, 128  ;;  %p104_p4 = scmp.lt.s32.totalorder %s16_s10, %s16_s10 }
   0xa   :  { %p100_p3 = scmp.ne.s32.totalorder %s16_s10, %s99_s20  ;;  %p105_p5 = scmp.lt.s32.totalorder %s99_s20, %s99_s20 }
   0xc   :  { %p106_p6 = por %p105_p5, %p104_p4 }
   0xe   :  { %p107_p7 = pnand %p106_p6, %p100_p3 }
  0x10   :  { %110 = shalt.err (!%p107_p7)
}
  0x11   :  { %18 = dma.hbm_to_vmem [thread:$0]  %s184_s0, 128, %s16_s10, [#allocation3]  }
  0x12   :  { %s111_s25 = scalar_lea.hbm %s185_s1, 128 }
  0x13   :  { %p112_p8 = scmp.ne.s32.totalorder %s185_s1, %s111_s25  ;;  %p115_p9 = scmp.lt.u32.totalorder %s111_s25, %s185_s1 }
  0x15   :  { %p117_p10 = pnand %p115_p9, %p112_p8 }
  0x17   :  { %120 = shalt.err (!%p117_p10)
}
  0x18   :  { %s121_s30 = scalar_lea.vmem %s26_s12, 128  ;;  %p126_p12 = scmp.lt.s32.totalorder %s26_s12, %s26_s12 }
  0x19   :  { %p122_p11 = scmp.ne.s32.totalorder %s26_s12, %s121_s30  ;;  %p127_p13 = scmp.lt.s32.totalorder %s121_s30, %s121_s30 }
  0x1b   :  { %p128_p0 = por %p127_p13, %p126_p12 }
  0x1d   :  { %p129_p1 = pnand %p128_p0, %p122_p11 }
  0x1f   :  { %132 = shalt.err (!%p129_p1)
}
  0x20   :  { %28 = dma.hbm_to_vmem [thread:$0]  %s185_s1, 128, %s26_s12, [#allocation5]  }
  0x21   :  { %133 = dma.done.wait [#allocation3], 128  }
  0x22   :  { %134 = vsyncadd [#allocation3], 4294967168 }
  0x23   :  { %135 = dma.done.wait [#allocation5], 128  }
  0x24   :  { %136 = vsyncadd [#allocation5], 4294967168  ;;  %vm37_vm0 = vcmask 261120   ;;  %v35_v0 = vld [vmem:[#allocation2] sm:$0xff]  ;;  %v36_v11 = vld [vmem:[#allocation4] sm:$0xff]  ;;  %vm62_vm1 = vcmask 7168  }
  0x25   :  { %v38_v1 = vsel %vm37_vm0, %v35_v0, -inf }
  0x26   :  { %39 = vmax.xlane.f32.xlu0 %v38_v1 }
  0xb3   :  { %v40_v2 = vpop.xlane.xlu0 %39 }
  0xb4   :  { %v41_v3 = vsub.f32 %v35_v0, %v40_v2 }
  0xb6   :  { %v42_v4 = vmul.f32 1.442695, %v41_v3 }
  0xb8   :  { %85 = vpow2.f32 %v42_v4 }
  0xc2   :  { %v86_v5 = vpop.eup %85 }
  0xc3   :  { %v44_v6 = vsel %vm37_vm0, %v86_v5, 0.0 }
  0xc4   :  { %45 = vadd.xlane.f32.xlu0 %v44_v6 }
 0x151   :  { %v46_v7 = vpop.xlane.xlu0 %45 }
 0x152   :  { %87 = vlog2.f32 %v46_v7 }
 0x15c   :  { %v88_v8 = vpop.eup %87 }
 0x15d   :  { %v48_v9 = vmul.f32 0.6931472, %v88_v8 }
 0x15f   :  { %v49_v10 = vadd.f32 %v48_v9, %v40_v2 }
 0x161   :  { %v50_v12 = vsub.f32 %v49_v10, %v35_v0 }
 0x163   :  { %v51_v13 = vmul.f32 %v50_v12, %v36_v11 }
 0x165   :  { %v52_v14 = vsel %vm37_vm0, %v51_v13, 0.0 }
 0x166   :  { %53 = vadd.xlane.f32.xlu1 %v52_v14 }
 0x1f3   :  { %v54_v15 = vpop.xlane.xlu1 %53 }
 0x1f4   :  { %v63_v16 = vsel %vm62_vm1, %v54_v15, 0.0 }
 0x1f5   :  { %64 = vadd.xlane.f32.xlu1 %v63_v16 }
 0x282   :  { %v65_v17 = vpop.xlane.xlu1 %64 }
 0x283   :  { %v66_v18 = vrot.slane %v65_v17, 4 }
 0x285   :  { %v67_v19 = vadd.f32 %v66_v18, %v65_v17 }
 0x287   :  { %v68_v20 = vrot.slane %v67_v19, 2 }
 0x289   :  { %v69_v21 = vadd.f32 %v68_v20, %v67_v19 }
 0x28b   :  { %v70_v22 = vrot.slane %v69_v21, 1 }
 0x28d   :  { %v71_v23 = vadd.f32 %v70_v22, %v69_v21 }
 0x28f   :  { %81 = vpush %v71_v23 }
 0x2c0   :  { %s82_s1 = spop %81 }
 0x2c1   :  { %v73_v24 = vstv %s82_s1 }
 0x2c2   :  { %74 = vst [vmem:[%s186_s2] sm:$0xff] %v73_v24 }
 0x2c3   :  { %79 = vsyncpa [#allocation3], 1 }
 0x2c4   :  { %80 = vsyncpa [#allocation5], 1 }

</bundles_post_ra>
